<compile_context>
chip_gen: v6e
topology: v6e:2x2x1
jax: 0.10.0
libtpu: 0.0.40
codegen_flags: <defaults>
</compile_context>

<pallas_src>
import jax
import jax.numpy as jnp
from jax import lax
from jax.experimental import pallas as pl
from jax.experimental.pallas import tpu as pltpu

LN_EPS = 1e-5          # PyTorch nn.LayerNorm default
_UNROLL_LIMIT = 64     # Python-unroll row loops up to this TS, fori_loop beyond


def _pos_ln_epilogue(tok_tile, pos_ref, gamma_ref, beta_ref, out_ref):
    """position-embedding add + (eval-mode) dropout + LayerNorm, all in f32."""
    x = tok_tile.astype(jnp.float32) + pos_ref[...].astype(jnp.float32)
    # TODO(synk): dropout is eval-mode identity (training-mode RNG mask omitted).
    mean = jnp.mean(x, axis=-1, keepdims=True)
    xc = x - mean
    var = jnp.mean(xc * xc, axis=-1, keepdims=True)       # two-pass (PyTorch-style) variance
    norm = xc * lax.rsqrt(var + LN_EPS)
    gamma = gamma_ref[...].astype(jnp.float32)
    beta = beta_ref[...].astype(jnp.float32)
    out_ref[...] = (norm * gamma + beta).astype(out_ref.dtype)


def _for_each_row(n_rows, issue_one):
    """issue_one(r) for r in [0, n_rows): unrolled for small n, fori_loop otherwise."""
    if n_rows <= _UNROLL_LIMIT:
        for r in range(n_rows):       # static unroll at trace time
            issue_one(r)
    else:
        def body(r, carry):
            issue_one(r)
            return carry
        lax.fori_loop(0, n_rows, body, 0, unroll=8)


# ----------------------------------------------------------------------------------------
# Fast path: token table is VMEM-resident (full-array BlockSpec); gather via dynamic slices.
# ----------------------------------------------------------------------------------------
def _embed_ln_vmem_table_kernel(ids_ref,    # SMEM  (B*S,) int32  -- scalar prefetch
                                tok_ref,    # VMEM  (V, D)        -- whole table, resident
                                pos_ref,    # VMEM  (TS, D)
                                gamma_ref,  # VMEM  (1, D)
                                beta_ref,   # VMEM  (1, D)
                                out_ref,    # VMEM  (TS, D)
                                gbuf):      # VMEM scratch (TS, D)
    s = pl.program_id(0)
    b = pl.program_id(1)
    TS = gbuf.shape[0]
    seq_len = pl.num_programs(0) * TS
    base = b * seq_len + s * TS

    def gather_row(r):
        tid = ids_ref[base + r]
        gbuf[pl.ds(r, 1), :] = tok_ref[pl.ds(tid, 1), :]

    _for_each_row(TS, gather_row)
    _pos_ln_epilogue(gbuf[...], pos_ref, gamma_ref, beta_ref, out_ref)


# ----------------------------------------------------------------------------------------
# Large-table path: HBM gather, double-buffered across the inner (batch) grid axis,
# aggregated wait (one semaphore / one wait per slot).
# ----------------------------------------------------------------------------------------
def _embed_ln_hbm_gather_kernel(ids_ref,    # SMEM  (B*S,) int32  -- scalar prefetch
                                tok_hbm,    # HBM   (V, D)        -- memory_space=pl.ANY
                                pos_ref,    # VMEM  (TS, D)
                                gamma_ref,  # VMEM  (1, D)
                                beta_ref,   # VMEM  (1, D)
                                out_ref,    # VMEM  (TS, D)
                                gbuf,       # VMEM scratch (2, TS, D) -- double buffer
                                sems):      # DMA semaphores (2,) -- one aggregated per slot
    s = pl.program_id(0)
    b = pl.program_id(1)
    nb = pl.num_programs(1)
    TS = gbuf.shape[1]
    seq_len = pl.num_programs(0) * TS
    row0 = s * TS
    slot = b % 2

    def start_gather(batch_idx, slot_idx):
        base = batch_idx * seq_len + row0

        def issue_one(r):
            tid = ids_ref[base + r]
            pltpu.make_async_copy(
                tok_hbm.at[pl.ds(tid, 1), :],
                gbuf.at[slot_idx, pl.ds(r, 1), :],
                sems.at[slot_idx]).start()

        _for_each_row(TS, issue_one)

    # Prime: first inner step of this seq tile gathers its own rows into slot 0.
    @pl.when(b == 0)
    def _():
        start_gather(0, 0)

    # Prefetch the NEXT batch element's rows into the other slot.  The id scalar reads
    # happen here, BEFORE the wait below (wait() breaks SMEM sst->sld forwarding).
    @pl.when(b + 1 < nb)
    def _():
        start_gather(b + 1, 1 - slot)

    # Aggregated wait: single descriptor sized for the whole (TS, D) slot buffer; the TS
    # row copies all signalled sems[slot] so their byte counts sum to this descriptor.
    pltpu.make_async_copy(gbuf.at[slot], gbuf.at[slot], sems.at[slot]).wait()

    _pos_ln_epilogue(gbuf[slot], pos_ref, gamma_ref, beta_ref, out_ref)


def _pick_seq_tile(seq_len, cap=256):
    """Largest multiple-of-8 divisor of seq_len that is <= cap."""
    best = 0
    ts = 8
    while ts <= min(seq_len, cap):
        if seq_len % ts == 0:
            best = ts
        ts += 8
    if best == 0:
        raise ValueError(
            f"seq_len={seq_len} has no multiple-of-8 divisor <= {cap}; pad it to a multiple of 8.")
    return best


def transformer_input_embedding(token_ids, tok_table, pos_table, gamma, beta, *,
                                seq_tile=None, force_hbm_gather=False,
                                vmem_table_bytes_cap=8 * 1024 * 1024,
                                out_dtype=jnp.float32):
    B, S = token_ids.shape
    V, D = tok_table.shape
    assert pos_table.shape[1] == D and pos_table.shape[0] >= S

    TS = seq_tile if seq_tile is not None else _pick_seq_tile(S)
    if S % TS or TS % 8:
        raise ValueError(f"seq tile {TS} must divide seq_len {S} and be a multiple of 8")
    num_s_tiles = S // TS

    # TODO(synk): for very large B*S, switch the ids to a blocked SMEM input instead of
    # scalar-prefetching the whole flattened array (1D SMEM pads to next power of 2).
    ids_flat = token_ids.reshape(B * S).astype(jnp.int32)
    gamma2d = gamma.reshape(1, D)
    beta2d = beta.reshape(1, D)

    tok_isz = jnp.dtype(tok_table.dtype).itemsize
    pos_isz = jnp.dtype(pos_table.dtype).itemsize
    out_isz = jnp.dtype(out_dtype).itemsize
    table_bytes = V * D * tok_isz
    use_vmem_table = (not force_hbm_gather) and table_bytes <= vmem_table_bytes_cap

    pos_spec = pl.BlockSpec((TS, D), lambda s, b, ids: (s, 0))   # resident across batch axis
    gb_spec = pl.BlockSpec((1, D), lambda s, b, ids: (0, 0))
    out_spec = pl.BlockSpec((TS, D), lambda s, b, ids: (b * num_s_tiles + s, 0))

    if use_vmem_table:
        kernel = _embed_ln_vmem_table_kernel
        tok_spec = pl.BlockSpec((V, D), lambda s, b, ids: (0, 0))   # whole table in VMEM
        scratch = [pltpu.VMEM((TS, D), tok_table.dtype)]
        dims = ("parallel", "parallel")
        gather_vmem = 2 * table_bytes + TS * D * tok_isz
    else:
        kernel = _embed_ln_hbm_gather_kernel
        tok_spec = pl.BlockSpec(memory_space=pl.ANY)                # raw HBM ref, manual DMA
        scratch = [pltpu.VMEM((2, TS, D), tok_table.dtype),
                   pltpu.SemaphoreType.DMA((2,))]
        dims = ("parallel", "arbitrary")    # batch axis carries the gather slot state
        gather_vmem = 2 * TS * D * tok_isz

    # Only set a VMEM limit when the derived working set needs more than the default.
    approx_vmem = 2 * TS * D * (pos_isz + out_isz) + gather_vmem + (2 << 20)
    vmem_limit = None
    if approx_vmem > 24 * 1024 * 1024:
        vmem_limit = min(int(approx_vmem) + (8 << 20), 96 * 1024 * 1024)

    grid_spec = pltpu.PrefetchScalarGridSpec(
        num_scalar_prefetch=1,
        grid=(num_s_tiles, B),              # seq outer (megacore split lands here), batch inner
        in_specs=[tok_spec, pos_spec, gb_spec, gb_spec],
        out_specs=out_spec,
        scratch_shapes=scratch,
    )

    bytes_accessed = (B * S * D) * (tok_isz + out_isz) + S * D * pos_isz
    cost = pl.CostEstimate(flops=10 * B * S * D,
                           transcendentals=B * S,
                           bytes_accessed=int(bytes_accessed))

    out2d = pl.pallas_call(
        kernel,
        out_shape=jax.ShapeDtypeStruct((B * S, D), out_dtype),
        grid_spec=grid_spec,
        compiler_params=pltpu.CompilerParams(
            dimension_semantics=dims,
            vmem_limit_bytes=vmem_limit),
        cost_estimate=cost,
    )(ids_flat, tok_table, pos_table, gamma2d, beta2d)

    return out2d.reshape(B, S, D)


if __name__ == "__main__":
    # Small, lane-dense shapes: D is a multiple of 128 so stores are unmasked; S is a
    # multiple of 8 so the (TS, D) block satisfies the (8,128) rule.
    vocab_size, embed_dim, max_seq_len = 64, 128, 16
    B, S = 2, 8

    key = jax.random.PRNGKey(0)
    k_ids, k_tok, k_pos = jax.random.split(key, 3)

    token_ids = jax.random.randint(k_ids, (B, S), 0, vocab_size, dtype=jnp.int32)
    # nn.Embedding default init ~ N(0, 1); LayerNorm: gamma=1, beta=0.
    tok_table = jax.random.normal(k_tok, (vocab_size, embed_dim), dtype=jnp.float32)
    pos_table = jax.random.normal(k_pos, (max_seq_len, embed_dim), dtype=jnp.float32)
    gamma = jnp.ones((embed_dim,), dtype=jnp.float32)
    beta = jnp.zeros((embed_dim,), dtype=jnp.float32)

    # Pure-JAX reference (dropout in eval mode).
    ref = tok_table[token_ids] + pos_table[:S][None, :, :]
    m = ref.mean(-1, keepdims=True)
    v = jnp.square(ref - m).mean(-1, keepdims=True)
    ref = (ref - m) * lax.rsqrt(v + LN_EPS) * gamma.reshape(1, 1, -1) + beta.reshape(1, 1, -1)

    # Path 1: small-vocab fast path (token table VMEM-resident, in-VMEM gather).
    out_vmem = jax.block_until_ready(
        transformer_input_embedding(token_ids, tok_table, pos_table, gamma, beta))
    # Path 2: large-vocab path (HBM table, cross-step double-buffered DMA gather,
    # aggregated waits) — forced here to exercise it at small shapes.
    out_hbm = jax.block_until_ready(
        transformer_input_embedding(token_ids, tok_table, pos_table, gamma, beta,
                                    force_hbm_gather=True))

    for name, out in (("vmem-table", out_vmem), ("hbm-gather", out_hbm)):
        assert out.shape == (B, S, embed_dim), f"{name}: bad shape {out.shape}"
        assert jnp.allclose(out, ref, atol=1e-3), f"{name} path mismatch vs reference"

    print("KERNEL_OK")
</pallas_src>

<mosaic_0001>
module attributes {stable_mosaic.version = 11 : i64} {
  func.func @_embed_ln_vmem_table_kernel(%arg0: i32, %arg1: i32, %arg2: memref<16xi32, #tpu.memory_space<smem>>, %arg3: memref<64x128xf32, #tpu.memory_space<vmem>>, %arg4: memref<8x128xf32, #tpu.memory_space<vmem>>, %arg5: memref<1x128xf32, #tpu.memory_space<vmem>>, %arg6: memref<1x128xf32, #tpu.memory_space<vmem>>, %arg7: memref<8x128xf32, #tpu.memory_space<vmem>>, %arg8: memref<8x128xf32, #tpu.memory_space<vmem>>) attributes {dimension_semantics = [#tpu.dimension_semantics<parallel>, #tpu.dimension_semantics<parallel>], iteration_bounds = array<i64: 1, 2>, scalar_prefetch = 1 : i64, scratch_operands = 1 : i64, tpu.core_type = #tpu.core_type<tc>, window_params = [{pipeline_mode = #tpu.pipeline_mode<synchronous>, transform_indices = @transform_0, window_bounds = array<i64: 64, 128>}, {transform_indices = @transform_1, window_bounds = array<i64: 8, 128>}, {pipeline_mode = #tpu.pipeline_mode<synchronous>, transform_indices = @transform_2, window_bounds = array<i64: 1, 128>}, {pipeline_mode = #tpu.pipeline_mode<synchronous>, transform_indices = @transform_3, window_bounds = array<i64: 1, 128>}, {transform_indices = @transform_4, window_bounds = array<i64: 8, 128>}]} {
    %c8_i32 = arith.constant 8 : i32
    %0 = arith.muli %arg1, %c8_i32 : i32
    %c8_i32_0 = arith.constant 8 : i32
    %1 = arith.muli %arg0, %c8_i32_0 : i32
    %2 = arith.addi %0, %1 : i32
    %c0_i32 = arith.constant 0 : i32
    %3 = arith.addi %2, %c0_i32 : i32
    %4 = arith.index_cast %3 : i32 to index
    %5 = memref.load %arg2[%4] : memref<16xi32, #tpu.memory_space<smem>>
    %6 = arith.index_cast %5 : i32 to index
    %c0 = arith.constant 0 : index
    %7 = vector.load %arg3[%6, %c0] : memref<64x128xf32, #tpu.memory_space<vmem>>, vector<1x128xf32>
    %c0_1 = arith.constant 0 : index
    %c0_2 = arith.constant 0 : index
    %8 = vector.load %arg8[%c0_1, %c0_2] : memref<8x128xf32, #tpu.memory_space<vmem>>, vector<1x128xf32>
    tpu.vector_store %arg8[%c0_1, %c0_2], %7 {strides = array<i32>} : memref<8x128xf32, #tpu.memory_space<vmem>>, vector<1x128xf32>,
    %c1_i32 = arith.constant 1 : i32
    %9 = arith.addi %2, %c1_i32 : i32
    %10 = arith.index_cast %9 : i32 to index
    %11 = memref.load %arg2[%10] : memref<16xi32, #tpu.memory_space<smem>>
    %12 = arith.index_cast %11 : i32 to index
    %c0_3 = arith.constant 0 : index
    %13 = vector.load %arg3[%12, %c0_3] : memref<64x128xf32, #tpu.memory_space<vmem>>, vector<1x128xf32>
    %c1 = arith.constant 1 : index
    %c0_4 = arith.constant 0 : index
    %14 = vector.load %arg8[%c1, %c0_4] : memref<8x128xf32, #tpu.memory_space<vmem>>, vector<1x128xf32>
    tpu.vector_store %arg8[%c1, %c0_4], %13 {strides = array<i32>} : memref<8x128xf32, #tpu.memory_space<vmem>>, vector<1x128xf32>,
    %c2_i32 = arith.constant 2 : i32
    %15 = arith.addi %2, %c2_i32 : i32
    %16 = arith.index_cast %15 : i32 to index
    %17 = memref.load %arg2[%16] : memref<16xi32, #tpu.memory_space<smem>>
    %18 = arith.index_cast %17 : i32 to index
    %c0_5 = arith.constant 0 : index
    %19 = vector.load %arg3[%18, %c0_5] : memref<64x128xf32, #tpu.memory_space<vmem>>, vector<1x128xf32>
    %c2 = arith.constant 2 : index
    %c0_6 = arith.constant 0 : index
    %20 = vector.load %arg8[%c2, %c0_6] : memref<8x128xf32, #tpu.memory_space<vmem>>, vector<1x128xf32>
    tpu.vector_store %arg8[%c2, %c0_6], %19 {strides = array<i32>} : memref<8x128xf32, #tpu.memory_space<vmem>>, vector<1x128xf32>,
    %c3_i32 = arith.constant 3 : i32
    %21 = arith.addi %2, %c3_i32 : i32
    %22 = arith.index_cast %21 : i32 to index
    %23 = memref.load %arg2[%22] : memref<16xi32, #tpu.memory_space<smem>>
    %24 = arith.index_cast %23 : i32 to index
    %c0_7 = arith.constant 0 : index
    %25 = vector.load %arg3[%24, %c0_7] : memref<64x128xf32, #tpu.memory_space<vmem>>, vector<1x128xf32>
    %c3 = arith.constant 3 : index
    %c0_8 = arith.constant 0 : index
    %26 = vector.load %arg8[%c3, %c0_8] : memref<8x128xf32, #tpu.memory_space<vmem>>, vector<1x128xf32>
    tpu.vector_store %arg8[%c3, %c0_8], %25 {strides = array<i32>} : memref<8x128xf32, #tpu.memory_space<vmem>>, vector<1x128xf32>,
    %c4_i32 = arith.constant 4 : i32
    %27 = arith.addi %2, %c4_i32 : i32
    %28 = arith.index_cast %27 : i32 to index
    %29 = memref.load %arg2[%28] : memref<16xi32, #tpu.memory_space<smem>>
    %30 = arith.index_cast %29 : i32 to index
    %c0_9 = arith.constant 0 : index
    %31 = vector.load %arg3[%30, %c0_9] : memref<64x128xf32, #tpu.memory_space<vmem>>, vector<1x128xf32>
    %c4 = arith.constant 4 : index
    %c0_10 = arith.constant 0 : index
    %32 = vector.load %arg8[%c4, %c0_10] : memref<8x128xf32, #tpu.memory_space<vmem>>, vector<1x128xf32>
    tpu.vector_store %arg8[%c4, %c0_10], %31 {strides = array<i32>} : memref<8x128xf32, #tpu.memory_space<vmem>>, vector<1x128xf32>,
    %c5_i32 = arith.constant 5 : i32
    %33 = arith.addi %2, %c5_i32 : i32
    %34 = arith.index_cast %33 : i32 to index
    %35 = memref.load %arg2[%34] : memref<16xi32, #tpu.memory_space<smem>>
    %36 = arith.index_cast %35 : i32 to index
    %c0_11 = arith.constant 0 : index
    %37 = vector.load %arg3[%36, %c0_11] : memref<64x128xf32, #tpu.memory_space<vmem>>, vector<1x128xf32>
    %c5 = arith.constant 5 : index
    %c0_12 = arith.constant 0 : index
    %38 = vector.load %arg8[%c5, %c0_12] : memref<8x128xf32, #tpu.memory_space<vmem>>, vector<1x128xf32>
    tpu.vector_store %arg8[%c5, %c0_12], %37 {strides = array<i32>} : memref<8x128xf32, #tpu.memory_space<vmem>>, vector<1x128xf32>,
    %c6_i32 = arith.constant 6 : i32
    %39 = arith.addi %2, %c6_i32 : i32
    %40 = arith.index_cast %39 : i32 to index
    %41 = memref.load %arg2[%40] : memref<16xi32, #tpu.memory_space<smem>>
    %42 = arith.index_cast %41 : i32 to index
    %c0_13 = arith.constant 0 : index
    %43 = vector.load %arg3[%42, %c0_13] : memref<64x128xf32, #tpu.memory_space<vmem>>, vector<1x128xf32>
    %c6 = arith.constant 6 : index
    %c0_14 = arith.constant 0 : index
    %44 = vector.load %arg8[%c6, %c0_14] : memref<8x128xf32, #tpu.memory_space<vmem>>, vector<1x128xf32>
    tpu.vector_store %arg8[%c6, %c0_14], %43 {strides = array<i32>} : memref<8x128xf32, #tpu.memory_space<vmem>>, vector<1x128xf32>,
    %c7_i32 = arith.constant 7 : i32
    %45 = arith.addi %2, %c7_i32 : i32
    %46 = arith.index_cast %45 : i32 to index
    %47 = memref.load %arg2[%46] : memref<16xi32, #tpu.memory_space<smem>>
    %48 = arith.index_cast %47 : i32 to index
    %c0_15 = arith.constant 0 : index
    %49 = vector.load %arg3[%48, %c0_15] : memref<64x128xf32, #tpu.memory_space<vmem>>, vector<1x128xf32>
    %c7 = arith.constant 7 : index
    %c0_16 = arith.constant 0 : index
    %50 = vector.load %arg8[%c7, %c0_16] : memref<8x128xf32, #tpu.memory_space<vmem>>, vector<1x128xf32>
    tpu.vector_store %arg8[%c7, %c0_16], %49 {strides = array<i32>} : memref<8x128xf32, #tpu.memory_space<vmem>>, vector<1x128xf32>,
    %c0_17 = arith.constant 0 : index
    %c0_18 = arith.constant 0 : index
    %51 = vector.load %arg8[%c0_17, %c0_18] : memref<8x128xf32, #tpu.memory_space<vmem>>, vector<8x128xf32>
    %c0_19 = arith.constant 0 : index
    %c0_20 = arith.constant 0 : index
    %52 = vector.load %arg4[%c0_19, %c0_20] : memref<8x128xf32, #tpu.memory_space<vmem>>, vector<8x128xf32>
    %53 = arith.addf %51, %52 : vector<8x128xf32>
    %cst = arith.constant dense<0.000000e+00> : vector<8xf32>
    %54 = vector.multi_reduction <add>, %53, %cst [1] : vector<8x128xf32> to vector<8xf32>
    %55 = vector.shape_cast %54 : vector<8xf32> to vector<8x1xf32>
    %cst_21 = arith.constant 1.280000e+02 : f32
    %56 = vector.broadcast %cst_21 : f32 to vector<8x1xf32>
    %57 = arith.divf %55, %56 : vector<8x1xf32>
    %58 = vector.broadcast %57 : vector<8x1xf32> to vector<8x128xf32>
    %59 = arith.subf %53, %58 : vector<8x128xf32>
    %60 = arith.mulf %59, %59 : vector<8x128xf32>
    %cst_22 = arith.constant dense<0.000000e+00> : vector<8xf32>
    %61 = vector.multi_reduction <add>, %60, %cst_22 [1] : vector<8x128xf32> to vector<8xf32>
    %62 = vector.shape_cast %61 : vector<8xf32> to vector<8x1xf32>
    %cst_23 = arith.constant 1.280000e+02 : f32
    %63 = vector.broadcast %cst_23 : f32 to vector<8x1xf32>
    %64 = arith.divf %62, %63 : vector<8x1xf32>
    %cst_24 = arith.constant 9.99999974E-6 : f32
    %65 = vector.broadcast %cst_24 : f32 to vector<8x1xf32>
    %66 = arith.addf %64, %65 : vector<8x1xf32>
    %67 = math.rsqrt %66 : vector<8x1xf32>
    %68 = vector.broadcast %67 : vector<8x1xf32> to vector<8x128xf32>
    %69 = arith.mulf %59, %68 : vector<8x128xf32>
    %c0_25 = arith.constant 0 : index
    %c0_26 = arith.constant 0 : index
    %70 = vector.load %arg5[%c0_25, %c0_26] : memref<1x128xf32, #tpu.memory_space<vmem>>, vector<1x128xf32>
    %c0_27 = arith.constant 0 : index
    %c0_28 = arith.constant 0 : index
    %71 = vector.load %arg6[%c0_27, %c0_28] : memref<1x128xf32, #tpu.memory_space<vmem>>, vector<1x128xf32>
    %72 = vector.broadcast %70 : vector<1x128xf32> to vector<8x128xf32>
    %73 = arith.mulf %69, %72 : vector<8x128xf32>
    %74 = vector.broadcast %71 : vector<1x128xf32> to vector<8x128xf32>
    %75 = arith.addf %73, %74 : vector<8x128xf32>
    %c0_29 = arith.constant 0 : index
    %c0_30 = arith.constant 0 : index
    %76 = vector.load %arg7[%c0_29, %c0_30] : memref<8x128xf32, #tpu.memory_space<vmem>>, vector<8x128xf32>
    tpu.vector_store %arg7[%c0_29, %c0_30], %75 {strides = array<i32>} : memref<8x128xf32, #tpu.memory_space<vmem>>, vector<8x128xf32>,
    return
  }
  func.func @transform_0(%arg0: i32, %arg1: i32, %arg2: memref<16xi32, #tpu.memory_space<smem>>) -> (i32, i32) {
    %c0_i32 = arith.constant 0 : i32
    %c0_i32_0 = arith.constant 0 : i32
    %c0_i32_1 = arith.constant 0 : i32
    return %c0_i32, %c0_i32_0 : i32, i32
  }
  func.func @transform_1(%arg0: i32, %arg1: i32, %arg2: memref<16xi32, #tpu.memory_space<smem>>) -> (i32, i32) {
    %c0_i32 = arith.constant 0 : i32
    %c0_i32_0 = arith.constant 0 : i32
    return %arg0, %c0_i32 : i32, i32
  }
  func.func @transform_2(%arg0: i32, %arg1: i32, %arg2: memref<16xi32, #tpu.memory_space<smem>>) -> (i32, i32) {
    %c0_i32 = arith.constant 0 : i32
    %c0_i32_0 = arith.constant 0 : i32
    %c0_i32_1 = arith.constant 0 : i32
    return %c0_i32, %c0_i32_0 : i32, i32
  }
  func.func @transform_3(%arg0: i32, %arg1: i32, %arg2: memref<16xi32, #tpu.memory_space<smem>>) -> (i32, i32) {
    %c0_i32 = arith.constant 0 : i32
    %c0_i32_0 = arith.constant 0 : i32
    %c0_i32_1 = arith.constant 0 : i32
    return %c0_i32, %c0_i32_0 : i32, i32
  }
  func.func @transform_4(%arg0: i32, %arg1: i32, %arg2: memref<16xi32, #tpu.memory_space<smem>>) -> (i32, i32) {
    %c1_i32 = arith.constant 1 : i32
    %0 = arith.muli %arg1, %c1_i32 : i32
    %1 = arith.addi %0, %arg0 : i32
    %c0_i32 = arith.constant 0 : i32
    %c0_i32_0 = arith.constant 0 : i32
    return %1, %c0_i32 : i32, i32
  }
}

</mosaic_0001>

<bundles_post_ra>
// kernel: tpu_custom_call.1
= control target key start
LH: loop header
LB: loop body
LE: loop exit
PB: predicated region body
PF: predicated region fallthrough
CT: control target
= control target key end

     0   :  { %s653_s18 = smov [#allocation4]   ;;  %s837_s0 = inlined_call_operand.hbm [shape: s32[16], index: 0, kind: input, shape index: {}]   ;;  %s838_s1 = inlined_call_operand.hbm [shape: f32[64,128], index: 1, kind: input, shape index: {}]   ;;  %s839_s2 = inlined_call_operand.hbm [shape: f32[16,128], index: 2, kind: input, shape index: {}]   ;;  %s840_s3 = inlined_call_operand.vmem [shape: f32[1,128], index: 3, kind: input, shape index: {}]   ;;  %s841_s4 = inlined_call_operand.vmem [shape: f32[1,128], index: 4, kind: input, shape index: {}]   ;;  %s842_s5 = inlined_call_operand.hbm [shape: f32[16,128], index: 5, kind: output, shape index: {}]  }
   0x1   :  { %845 = sst [smem:[#allocation16_spill]] %s838_s1 }
   0x2   :  { %846 = sst [smem:[#allocation17_spill]] %s839_s2 }
   0x3   :  { %11 = dma.hbm_to_smem %s837_s0, 16, %s653_s18, [#allocation3] }
   0x4   :  { %615 = dma.done.wait [#allocation3], 16 }
   0x5   :  { %616 = vsyncadd [#allocation3], 4294967280 }
   0x6   :  { %13 = sfence }
   0x7   :  { %14 = vsyncpa [#allocation6], 0 }
   0x8   :  { %15 = vsyncpa [#allocation9], 0 }
   0x9   :  { %16 = vsyncpa [#allocation7], 0 }
   0xa   :  { %18 = vsyncpa [#allocation7 + $0x1], 0  ;;  %s692_s21 = smov 0   ;;  %s694_s22 = smov 0  }
   0xb   :  { %s696_s23 = smov 0   ;;  %s698_s24 = smov 0  }
   0xc   :  { %s700_s25 = smov 0   ;;  %s702_s26 = smov 0  }
   0xd LB: > { %s408_s0 = sadd.s32 4294967295, %s651_s26   ;;  %s409_s27 = sadd.s32 4294967294, %s651_s26   ;;  %s651_s26 = sphi %s702_s26, %s24_s26   ;;  %s647_s25 = sphi %s700_s25, %s862_s25   ;;  %s643_s24 = sphi %s698_s24, %s861_s24   ;;  %s639_s23 = sphi %s696_s23, %s860_s23   ;;  %s635_s22 = sphi %s694_s22, %s859_s22   ;;  %s631_s21 = sphi %s692_s21, %s858_s21  }
   0xe   : > { %s33_s28 = sadd.s32 1, %s647_s25  ;;  %s134_s29 = sadd.s32 1, %s639_s23 }
   0xf   : > { %p34_p0 = scmp.ge.s32.totalorder %s33_s28, 2  ;;  %p144_p1 = scmp.ne.s32.totalorder %s639_s23, %s635_s22 }
  0x10   : > { %p145_p2 = scmp.eq.s32.totalorder %s408_s0, 1  ;;  %p150_p3 = scmp.ne.s32.totalorder %s635_s22, %s631_s21 }
  0x11   : > { %s864_s28 = smov (%p34_p0, %s33_s28), 0  ;;  %p151_p5 = scmp.eq.s32.totalorder %s409_s27, 1 }
  0x12   : > { %847 = sst [smem:[#allocation15_spill]] %s864_s28  ;;  %p732_p4 = por %p145_p2, %p144_p1 }
  0x13   : > { %s131_s6 = ssub.s32 %s647_s25, %s864_s28  ;;  %p410_p6 = scmp.ge.s32.totalorder %s651_s26, 1 }
  0x14   : > { %s848_s30 = scalar_select %p732_p4, 1, 0 }
  0x15   : > { %p132_p7 = scmp.eq.s32.totalorder %s131_s6, 0  ;;  %p739_p8 = por %p151_p5, %p150_p3 }
  0x16   : > { %p158_p9 = scmp.lt.s32.totalorder %s651_s26, 3  ;;  %p751_p11 = scmp.eq.s32.totalorder %s408_s0, 0 }
  0x17   : > { %s849_s7 = scalar_select %p739_p8, 1, 0 }
  0x18   : > { %s745_s8 = scalar_select %p132_p7, %s639_s23, %s134_s29  }
  0x19   : > { %p747_p10 = pnand %p410_p6, %p158_p9  ;;  %s654_s11 = smov [#allocation5]  }
  0x1a   : > { %s170_s12 = sshll.u32 %s654_s11, 4  ;;  %s655_s14 = smov [#allocation8]   ;;  %s171_s12 = int_to_ptr.vmem [resolvable:$true] %s170_s12 }
  0x1b   : > { %p434_p12 = pneg %p747_p10  ;;  %s186_s15 = sshll.u32 %s655_s14, 4  ;;  %s187_s15 = int_to_ptr.vmem [resolvable:$true] %s186_s15 }
  0x1c   : > { %s524_s16 = scalar_lea.vmem %s171_s12, 1024  ;;  %p532_p5 = scmp.lt.s32.totalorder %s171_s12, %s171_s12 }
  0x1d   : > { %p759_p13 = pnand %p751_p11, %p434_p12  ;;  %p525_p1 = scmp.ne.s32.totalorder %s171_s12, %s524_s16 }
  0x1e   : > { %p533_p6 = scmp.lt.s32.totalorder %s524_s16, %s524_s16 }
  0x1f   : > { %p515_p0 = pneg %p759_p13 }
  0x20   : > { %p534_p7 = por %p533_p6, %p532_p5 }
  0x21   : > { %p527_p2 = pnand %p525_p1, %p515_p0 }
  0x23   : > { %p528_p3 = pneg %p527_p2 }
  0x25   : > { %p535_p9 = pnand %p534_p7, %p528_p3 }
  0x27   : > { %538 = shalt.err (!%p535_p9)
}
  0x28   : > { %s656_s17 = smov 128   ;;  %s657_s18 = smov 8  }
  0x29   : > { %s853_s1 = sld [smem:[#allocation16_spill]]  ;;  %s550_s0 = scalar_lea.vmem %s187_s15, 128 }
  0x2a   : > { %p551_p12 = scmp.ne.s32.totalorder %s187_s15, %s550_s0  ;;  %p558_p8 = scmp.lt.s32.totalorder %s187_s15, %s187_s15 }
  0x2b   : > { %p559_p4 = scmp.lt.s32.totalorder %s550_s0, %s550_s0 }
  0x2c   : > { %p553_p1 = pnand %p551_p12, %p515_p0 }
  0x2d   : > { %p560_p5 = por %p559_p4, %p558_p8 }
  0x2e   : > { %p554_p2 = pneg %p553_p1 }
  0x2f   : > { %437 = dma.hbm_to_vmem [thread:$0]  (!%p759_p13), %s853_s1, 1024, %s171_s12, [#allocation6], %s656_s17, %s656_s17, %s657_s18  }
  0x30   : > { %p561_p3 = pnand %p560_p5, %p554_p2 }
  0x32   : > { %564 = shalt.err (!%p561_p3)
}
  0x33   : > { %s854_s2 = sld [smem:[#allocation17_spill]] }
  0x35   : > { %205 = sbr.rel (%p747_p10) target bundleno = 407 (0x197), region = 36 }
  0x39   : > { %440 = dma.hbm_to_vmem [thread:$0]  (!%p759_p13), %s854_s2, 128, %s187_s15, [#allocation9]  }
  0x3a   : > { %618 = dma.done.wait (%p751_p11), [#allocation6], 1024  }
  0x3b   : > { %620 = vsyncadd (%p751_p11), [#allocation6], 4294966272 }
  0x3c   : > { %622 = dma.done.wait (%p751_p11), [#allocation9], 128  }
  0x3d   : > { %624 = vsyncadd (%p751_p11), [#allocation9], 4294967168  ;;  %s417_s6 = sshll.u32 %s643_s24, 3  ;;  %v274_v8 = vld [vmem:[#allocation8] sm:$0xff]  ;;  %v418_v19 = vld [vmem:[%s840_s3] ss:$0 sm:$0xff] }
  0x3e   : > { %s234_s11 = sld [smem:[#allocation4 + %s417_s6]]  ;;  %s238_s12 = sadd.s32 1, %s417_s6  ;;  %v419_v21 = vld [vmem:[%s841_s4] ss:$0 sm:$0xff] }
  0x3f   : > { %s239_s13 = sld [smem:[#allocation4 + %s238_s12]]  ;;  %s243_s14 = sadd.s32 2, %s417_s6 }
  0x40   : > { %s244_s9 = sld [smem:[#allocation4 + %s243_s14]]  ;;  %s248_s15 = sadd.s32 3, %s417_s6 }
  0x41   : > { %s249_s16 = sld [smem:[#allocation4 + %s248_s15]]  ;;  %s253_s17 = sadd.s32 4, %s417_s6 }
  0x42   : > { %s254_s18 = sld [smem:[#allocation4 + %s253_s17]]  ;;  %s258_s19 = sadd.s32 5, %s417_s6 }
  0x43   : > { %s259_s20 = sld [smem:[#allocation4 + %s258_s19]]  ;;  %s263_s0 = sadd.s32 6, %s417_s6 }
  0x44   : > { %s264_s27 = sld [smem:[#allocation4 + %s263_s0]]  ;;  %s235_s29 = scalar_lea.vmem [#allocation5], %s234_s11 }
  0x45   : > { %v236_v0 = vld [vmem:[%s235_s29] sm:$0x1]  ;;  %s268_s1 = sadd.s32 7, %s417_s6  ;;  %s240_s10 = scalar_lea.vmem [#allocation5], %s239_s13 }
  0x46   : > { %237 = vst [vmem:[#allocation2] sm:$0x1] %v236_v0  ;;  %v241_v1 = vld [vmem:[%s240_s10] sm:$0x1]  ;;  %s269_s2 = sld [smem:[#allocation4 + %s268_s1]]  ;;  %s245_s28 = scalar_lea.vmem [#allocation5], %s244_s9 }
  0x47   : > { %242 = vst [vmem:[#allocation2 + $0x1] sm:$0x1] %v241_v1  ;;  %v246_v2 = vld [vmem:[%s245_s28] sm:$0x1]  ;;  %s250_s12 = scalar_lea.vmem [#allocation5], %s249_s16  ;;  %s227_s1 = sand.u32 1, %s635_s22  }
  0x48   : > { %247 = vst [vmem:[#allocation2 + $0x2] sm:$0x1] %v246_v2  ;;  %v251_v3 = vld [vmem:[%s250_s12] sm:$0x1]  ;;  %s255_s14 = scalar_lea.vmem [#allocation5], %s254_s18  ;;  %s416_s28 = sshll.u32 %s227_s1, 3 }
  0x49   : > { %252 = vst [vmem:[#allocation2 + $0x3] sm:$0x1] %v251_v3  ;;  %v256_v4 = vld [vmem:[%s255_s14] sm:$0x1]  ;;  %s260_s15 = scalar_lea.vmem [#allocation5], %s259_s20  ;;  %s421_s17 = sshll.u32 %s643_s24, 7 }
  0x4a   : > { %257 = vst [vmem:[#allocation2 + $0x4] sm:$0x1] %v256_v4  ;;  %v261_v5 = vld [vmem:[%s260_s15] sm:$0x1]  ;;  %s265_s11 = scalar_lea.vmem [#allocation5], %s264_s27  ;;  %s229_s18 = scalar_lea.vmem [#allocation10], %s416_s28 }
  0x4b   : > { %262 = vst [vmem:[#allocation2 + $0x5] sm:$0x1] %v261_v5  ;;  %v266_v6 = vld [vmem:[%s265_s11] sm:$0x1]  ;;  %s320_s19 = sshll.u32 %s229_s18, 4  ;;  %s318_s27 = scalar_lea.hbm %s842_s5, %s421_s17  ;;  %s321_s19 = int_to_ptr.vmem [resolvable:$true] %s320_s19 }
  0x4c   : > { %267 = vst [vmem:[#allocation2 + $0x6] sm:$0x1] %v266_v6  ;;  %s270_s6 = scalar_lea.vmem [#allocation5], %s269_s2  ;;  %s306_s29 = scalar_lea.sflag [#allocation7], %s227_s1 }
  0x4d   : > { %v271_v7 = vld [vmem:[%s270_s6] sm:$0x1]  ;;  %s565_s10 = scalar_lea.vmem %s321_s19, 128  ;;  %p855_p8 = scmp.ne.s32.totalorder %s848_s30, 0 }
  0x4e   : > { %272 = vst [vmem:[#allocation2 + $0x7] sm:$0x1] %v271_v7  ;;  %p566_p4 = scmp.ne.s32.totalorder %s321_s19, %s565_s10  ;;  %s658_s12 = smov [#allocation10]  }
  0x4f   : > { %s569_s14 = sshll.u32 %s658_s12, 4  ;;  %s570_s14 = int_to_ptr.vmem [resolvable:$false] %s569_s14 }
  0x50   : > { %p567_p10 = pnand %p566_p4, %p855_p8  ;;  %s571_s24 = scalar_lea.vmem %s570_s14, 256 }
  0x51   : > { %p572_p13 = scmp.lt.s32.totalorder %s321_s19, %s570_s14  ;;  %p573_p0 = scmp.lt.s32.totalorder %s571_s24, %s565_s10 }
  0x52   : > { %p568_p11 = pneg %p567_p10 }
  0x53   : > { %p574_p6 = por %p573_p0, %p572_p13 }
  0x55   : > { %v273_v9 = vld [vmem:[#allocation2] sm:$0xff]  ;;  %p575_p7 = pnand %p574_p6, %p568_p11 }
  0x56   : > { %v275_v10 = vadd.f32 %v274_v8, %v273_v9 }
  0x58   : > { %276 = vadd.xlane.f32.xlu0 %v275_v10 }
  0xe1   : > { %v277_v11 = vpop.xlane.xlu0 %276 }
  0xe2   : > { %v279_v12 = vmul.f32 0.0078125, %v277_v11 }
  0xe4   : > { %v280_v13 = vsub.f32 %v275_v10, %v279_v12 }
  0xe6   : > { %v281_v14 = vmul.f32 %v280_v13, %v280_v13 }
  0xe8   : > { %282 = vadd.xlane.f32.xlu0 %v281_v14 }
 0x171   : > { %v283_v15 = vpop.xlane.xlu0 %282 }
 0x172   : > { %v284_v16 = vmul.f32 0.0078125, %v283_v15 }
 0x174   : > { %v285_v17 = vadd.f32 1e-05, %v284_v16 }
 0x176   : > { %503 = vrsqrt.f32 %v285_v17 }
 0x183   : > { %v504_v18 = vpop.eup %503 }
 0x184   : > { %v287_v20 = vmul.f32 %v504_v18, %v280_v13 }
 0x186   : > { %v296_v22 = vmul.f32 %v418_v19, %v287_v20 }
 0x188   : > { %v303_v23 = vadd.f32 %v419_v21, %v296_v22 }
 0x18a   : > { %304 = vst [vmem:[%s229_s18] sm:$0xff] %v303_v23 }
 0x18b   : > { %578 = shalt.err (!%p575_p7)
}
 0x18c   : > { %s579_s15 = scalar_lea.hbm %s318_s27, 128  ;;  %s583_s1 = scalar_lea.hbm %s842_s5, 256 }
 0x18d   : > { %p580_p9 = scmp.ne.s32.totalorder %s318_s27, %s579_s15  ;;  %p584_p2 = scmp.lt.s32.totalorder %s318_s27, %s842_s5 }
 0x18e   : > { %p585_p5 = scmp.lt.s32.totalorder %s583_s1, %s579_s15 }
 0x18f   : > { %p581_p12 = pnand %p580_p9, %p855_p8 }
 0x190   : > { %p586_p3 = por %p585_p5, %p584_p2 }
 0x191   : > { %p582_p1 = pneg %p581_p12 }
 0x193   : > { %p587_p4 = pnand %p586_p3, %p582_p1 }
 0x195   : > { %590 = shalt.err (!%p587_p4)
}
 0x196   : > { %432 = dma.vmem_to_hbm [thread:$0]  (%p855_p8), %s321_s19, 128, %s318_s27, %s306_s29  }
 0x197 PF: > { %p449_p10 = scmp.ge.s32.totalorder %s651_s26, 2  ;;  %s332_s13 = sand.u32 1, %s631_s21  }
 0x198   : > { %p856_p11 = scmp.ne.s32.totalorder %s849_s7, 0  ;;  %s333_s9 = scalar_lea.sflag [#allocation7], %s332_s13 }
 0x19a   : > { %p442_p13 = pnand %p449_p10, %p856_p11 }
 0x19c   : > { %p443_p0 = pneg %p442_p13 }
 0x19e   : > { %626 = dma.done.wait (%p443_p0), %s333_s9, 128  }
 0x19f   : > { %628 = vsyncadd (%p443_p0), %s333_s9, 4294967168  ;;  %s24_s26 = sadd.s32 1, %s651_s26   ;;  %s857_s30 = sld [smem:[#allocation15_spill]] }
 0x1a0   : > { %p21_p6 = scmp.ge.s32.totalorder %s24_s26, 4   ;;  %s858_s21 = smov %s635_s22 }
 0x1a1   : > { %s859_s22 = smov %s639_s23  ;;  %s860_s23 = smov %s745_s8 }
 0x1a2   : > { %s861_s24 = smov %s647_s25  ;;  %23 = sbr.rel (!%p21_p6) target bundleno = 13 (0xd), region = 86 }
 0x1a5   : > { %s862_s25 = smov %s857_s30 }
 0x1a7   :  { %338 = vsyncpa [#allocation6], 1 }
 0x1a8   :  { %340 = vsyncpa [#allocation6 + $0x1], 1 }
 0x1a9   :  { %341 = vsyncpa [#allocation9], 1 }
 0x1aa   :  { %342 = vsyncpa [#allocation7], 1 }
 0x1ab   :  { %344 = vsyncpa [#allocation7 + $0x1], 1 }

</bundles_post_ra>
